<compile_context>
chip_gen: v6e
topology: v6e:2x2x1
jax: 0.10.0
libtpu: 0.0.40
codegen_flags: <defaults>
</compile_context>

<pallas_src>
import jax
import jax.numpy as jnp
from jax.experimental import pallas as pl
from jax.experimental.pallas import tpu as pltpu


def _round_up(n, m):
    return ((n + m - 1) // m) * m


def mlp_encoder_kernel(x_ref, w1_ref, b1_ref, w2_ref, b2_ref, o_ref, h_ref):
    # Layer 1: x @ W1 + b1 -> ReLU  (MXU matmul, f32 accumulation)
    h = jnp.dot(x_ref[...], w1_ref[...], preferred_element_type=jnp.float32)
    h = jnp.maximum(h + b1_ref[...], 0.0)
    # Stage the intermediate once in VMEM scratch (in the matmul input dtype)
    # instead of letting a large f32 live range spill through the ld/st slots.
    h_ref[...] = h.astype(h_ref.dtype)
    # Layer 2: h @ W2 + b2 -> ReLU
    h2 = jnp.dot(h_ref[...], w2_ref[...], preferred_element_type=jnp.float32)
    h2 = jnp.maximum(h2 + b2_ref[...], 0.0)
    o_ref[...] = h2.astype(o_ref.dtype)


def mlp_encoder(state, w1_t, b1, w2_t, b2, *, batch_tile=256, compute_dtype=None):
    """state: [B, state_dim]; w*_t: [in, out]; b*: [out]. Returns [B, hid].

    compute_dtype: dtype fed to the MXU (e.g. jnp.bfloat16 on v6e/v7x).
    Accumulation is always f32; output keeps state.dtype.
    """
    B, D = state.shape
    H = w1_t.shape[1]
    out_dtype = state.dtype
    cdt = jnp.dtype(compute_dtype) if compute_dtype is not None else jnp.dtype(state.dtype)
    csz = cdt.itemsize
    osz = jnp.dtype(out_dtype).itemsize

    # Lane-dense feature dims (multiples of 128); row alignment 8 (f32) / 16 (bf16).
    Dp = _round_up(D, 128)
    Hp = _round_up(H, 128)
    row_align = 16 if csz == 2 else 8

    # Pick a batch tile: requested tile, clamped to the (aligned) batch, and
    # shrunk until the per-step VMEM footprint fits a conservative budget
    # (v7x has only 64 MiB physical VMEM).
    def footprint(bt_):
        return (2 * bt_ * Dp * csz           # x tile, double-buffered
                + 2 * bt_ * Hp * osz         # out tile, double-buffered
                + (Dp * Hp + Hp * Hp) * csz  # weights, single-buffered
                + 2 * Hp * 4                 # biases (f32), single-buffered
                + bt_ * Hp * csz)            # h scratch

    VMEM_BUDGET = 48 * 1024 * 1024
    bt = max(row_align, min(_round_up(batch_tile, row_align), _round_up(B, row_align)))
    while bt > row_align and footprint(bt) > VMEM_BUDGET:
        bt = max(row_align, _round_up(bt // 2, row_align))

    Bp = _round_up(B, bt)
    grid = (Bp // bt,)

    # Host-side zero padding (inert: zero weight rows/cols + zero bias -> ReLU(0)=0).
    xp = jnp.zeros((Bp, Dp), cdt).at[:B, :D].set(state.astype(cdt))
    w1p = jnp.zeros((Dp, Hp), cdt).at[:D, :H].set(w1_t.astype(cdt))
    w2p = jnp.zeros((Hp, Hp), cdt).at[:H, :H].set(w2_t.astype(cdt))
    b1p = jnp.zeros((1, Hp), jnp.float32).at[0, :H].set(b1.astype(jnp.float32))
    b2p = jnp.zeros((1, Hp), jnp.float32).at[0, :H].set(b2.astype(jnp.float32))

    vmem_bytes = int(min(max(footprint(bt) * 5 // 4 + (1 << 20), 1 << 20), 64 << 20))
    flops = 2 * Bp * (Dp * Hp + Hp * Hp)
    bytes_accessed = (Bp * Dp * csz + (Dp * Hp + Hp * Hp) * csz
                      + 2 * Hp * 4 + Bp * Hp * osz)

    # Weights/biases: constant index_map -> keep a single resident buffer.
    resident = dict(pipeline_mode=pl.Buffered(1))

    out = pl.pallas_call(
        mlp_encoder_kernel,
        out_shape=jax.ShapeDtypeStruct((Bp, Hp), out_dtype),
        grid_spec=pltpu.PrefetchScalarGridSpec(
            num_scalar_prefetch=0,
            grid=grid,
            in_specs=[
                pl.BlockSpec((bt, Dp), lambda i: (i, 0)),            # x batch tile
                pl.BlockSpec((Dp, Hp), lambda i: (0, 0), **resident),  # W1
                pl.BlockSpec((1, Hp), lambda i: (0, 0), **resident),   # b1
                pl.BlockSpec((Hp, Hp), lambda i: (0, 0), **resident),  # W2
                pl.BlockSpec((1, Hp), lambda i: (0, 0), **resident),   # b2
            ],
            out_specs=pl.BlockSpec((bt, Hp), lambda i: (i, 0)),
            scratch_shapes=[pltpu.VMEM((bt, Hp), cdt)],              # staged h
        ),
        compiler_params=pltpu.CompilerParams(
            dimension_semantics=("parallel",),
            vmem_limit_bytes=vmem_bytes,
        ),
        cost_estimate=pl.CostEstimate(
            flops=flops, transcendentals=0, bytes_accessed=bytes_accessed),
    )(xp, w1p, b1p, w2p, b2p)

    return out[:B, :H]


def init_params(key, state_dim, hid_size, dtype=jnp.float32):
    """torch.nn.Linear-style init (U[-1/sqrt(fan_in), 1/sqrt(fan_in)]),
    weights returned already transposed to [in, out]."""
    k1, k2, k3, k4 = jax.random.split(key, 4)
    bound1 = 1.0 / jnp.sqrt(state_dim)
    bound2 = 1.0 / jnp.sqrt(hid_size)
    w1_t = jax.random.uniform(k1, (state_dim, hid_size), dtype, -bound1, bound1)
    b1 = jax.random.uniform(k2, (hid_size,), dtype, -bound1, bound1)
    w2_t = jax.random.uniform(k3, (hid_size, hid_size), dtype, -bound2, bound2)
    b2 = jax.random.uniform(k4, (hid_size,), dtype, -bound2, bound2)
    return w1_t, b1, w2_t, b2


if __name__ == "__main__":
    state_dim = 16
    hid_size = 32
    batch = 8

    key = jax.random.PRNGKey(0)
    k_params, k_state = jax.random.split(key)
    w1_t, b1, w2_t, b2 = init_params(k_params, state_dim, hid_size)
    state = jax.random.normal(k_state, (batch, state_dim), jnp.float32)

    # plain-JAX reference
    ref = jnp.maximum(state @ w1_t + b1, 0.0)
    ref = jnp.maximum(ref @ w2_t + b2, 0.0)

    # f32 compute path (matches torch fp32 tightly)
    out = jax.block_until_ready(mlp_encoder(state, w1_t, b1, w2_t, b2))
    assert out.shape == (batch, hid_size)
    assert jnp.allclose(out, ref, atol=1e-5, rtol=1e-5)

    # bf16 compute path (hits bf16 MXU rate on v6e/v7x; looser tolerance)
    out_bf16 = jax.block_until_ready(
        mlp_encoder(state, w1_t, b1, w2_t, b2, compute_dtype=jnp.bfloat16))
    assert out_bf16.shape == (batch, hid_size)
    assert jnp.allclose(out_bf16, ref, atol=5e-2, rtol=5e-2)

    print("KERNEL_OK")
</pallas_src>

<mosaic_0001>
module attributes {stable_mosaic.version = 11 : i64} {
  func.func @mlp_encoder_kernel(%arg0: i32, %arg1: memref<8x128xf32, #tpu.memory_space<vmem>>, %arg2: memref<128x128xf32, #tpu.memory_space<vmem>>, %arg3: memref<1x128xf32, #tpu.memory_space<vmem>>, %arg4: memref<128x128xf32, #tpu.memory_space<vmem>>, %arg5: memref<1x128xf32, #tpu.memory_space<vmem>>, %arg6: memref<8x128xf32, #tpu.memory_space<vmem>>, %arg7: memref<8x128xf32, #tpu.memory_space<vmem>>) attributes {dimension_semantics = [#tpu.dimension_semantics<parallel>], iteration_bounds = array<i64: 1>, scalar_prefetch = 0 : i64, scratch_operands = 1 : i64, tpu.core_type = #tpu.core_type<tc>, window_params = [{transform_indices = @transform_0, window_bounds = array<i64: 8, 128>}, {pipeline_mode = #tpu.pipeline_mode<synchronous>, transform_indices = @transform_1, window_bounds = array<i64: 128, 128>}, {pipeline_mode = #tpu.pipeline_mode<synchronous>, transform_indices = @transform_2, window_bounds = array<i64: 1, 128>}, {pipeline_mode = #tpu.pipeline_mode<synchronous>, transform_indices = @transform_3, window_bounds = array<i64: 128, 128>}, {pipeline_mode = #tpu.pipeline_mode<synchronous>, transform_indices = @transform_4, window_bounds = array<i64: 1, 128>}, {transform_indices = @transform_5, window_bounds = array<i64: 8, 128>}]} {
    %c0 = arith.constant 0 : index
    %c0_0 = arith.constant 0 : index
    %0 = vector.load %arg1[%c0, %c0_0] : memref<8x128xf32, #tpu.memory_space<vmem>>, vector<8x128xf32>
    %c0_1 = arith.constant 0 : index
    %c0_2 = arith.constant 0 : index
    %1 = vector.load %arg2[%c0_1, %c0_2] : memref<128x128xf32, #tpu.memory_space<vmem>>, vector<128x128xf32>
    %cst = arith.constant dense<0.000000e+00> : vector<8x128xf32>
    %2 = tpu.matmul %0, %1, %cst {dimension_numbers = #tpu.dot_dimension_numbers<[1], [0], [0], [1], [0, 0, 1, 1], [], []>} : vector<8x128xf32>, vector<128x128xf32>, vector<8x128xf32> -> vector<8x128xf32>
    %c0_3 = arith.constant 0 : index
    %c0_4 = arith.constant 0 : index
    %3 = vector.load %arg3[%c0_3, %c0_4] : memref<1x128xf32, #tpu.memory_space<vmem>>, vector<1x128xf32>
    %4 = vector.broadcast %3 : vector<1x128xf32> to vector<8x128xf32>
    %5 = arith.addf %2, %4 : vector<8x128xf32>
    %cst_5 = arith.constant 0.000000e+00 : f32
    %6 = vector.broadcast %cst_5 : f32 to vector<8x128xf32>
    %7 = arith.maximumf %5, %6 : vector<8x128xf32>
    %c0_6 = arith.constant 0 : index
    %c0_7 = arith.constant 0 : index
    %8 = vector.load %arg7[%c0_6, %c0_7] : memref<8x128xf32, #tpu.memory_space<vmem>>, vector<8x128xf32>
    tpu.vector_store %arg7[%c0_6, %c0_7], %7 {strides = array<i32>} : memref<8x128xf32, #tpu.memory_space<vmem>>, vector<8x128xf32>,
    %c0_8 = arith.constant 0 : index
    %c0_9 = arith.constant 0 : index
    %9 = vector.load %arg7[%c0_8, %c0_9] : memref<8x128xf32, #tpu.memory_space<vmem>>, vector<8x128xf32>
    %c0_10 = arith.constant 0 : index
    %c0_11 = arith.constant 0 : index
    %10 = vector.load %arg4[%c0_10, %c0_11] : memref<128x128xf32, #tpu.memory_space<vmem>>, vector<128x128xf32>
    %cst_12 = arith.constant dense<0.000000e+00> : vector<8x128xf32>
    %11 = tpu.matmul %9, %10, %cst_12 {dimension_numbers = #tpu.dot_dimension_numbers<[1], [0], [0], [1], [0, 0, 1, 1], [], []>} : vector<8x128xf32>, vector<128x128xf32>, vector<8x128xf32> -> vector<8x128xf32>
    %c0_13 = arith.constant 0 : index
    %c0_14 = arith.constant 0 : index
    %12 = vector.load %arg5[%c0_13, %c0_14] : memref<1x128xf32, #tpu.memory_space<vmem>>, vector<1x128xf32>
    %13 = vector.broadcast %12 : vector<1x128xf32> to vector<8x128xf32>
    %14 = arith.addf %11, %13 : vector<8x128xf32>
    %cst_15 = arith.constant 0.000000e+00 : f32
    %15 = vector.broadcast %cst_15 : f32 to vector<8x128xf32>
    %16 = arith.maximumf %14, %15 : vector<8x128xf32>
    %c0_16 = arith.constant 0 : index
    %c0_17 = arith.constant 0 : index
    %17 = vector.load %arg6[%c0_16, %c0_17] : memref<8x128xf32, #tpu.memory_space<vmem>>, vector<8x128xf32>
    tpu.vector_store %arg6[%c0_16, %c0_17], %16 {strides = array<i32>} : memref<8x128xf32, #tpu.memory_space<vmem>>, vector<8x128xf32>,
    return
  }
  func.func @transform_0(%arg0: i32) -> (i32, i32) {
    %c0_i32 = arith.constant 0 : i32
    %c0_i32_0 = arith.constant 0 : i32
    return %arg0, %c0_i32 : i32, i32
  }
  func.func @transform_1(%arg0: i32) -> (i32, i32) {
    %c0_i32 = arith.constant 0 : i32
    %c0_i32_0 = arith.constant 0 : i32
    %c0_i32_1 = arith.constant 0 : i32
    return %c0_i32, %c0_i32_0 : i32, i32
  }
  func.func @transform_2(%arg0: i32) -> (i32, i32) {
    %c0_i32 = arith.constant 0 : i32
    %c0_i32_0 = arith.constant 0 : i32
    %c0_i32_1 = arith.constant 0 : i32
    return %c0_i32, %c0_i32_0 : i32, i32
  }
  func.func @transform_3(%arg0: i32) -> (i32, i32) {
    %c0_i32 = arith.constant 0 : i32
    %c0_i32_0 = arith.constant 0 : i32
    %c0_i32_1 = arith.constant 0 : i32
    return %c0_i32, %c0_i32_0 : i32, i32
  }
  func.func @transform_4(%arg0: i32) -> (i32, i32) {
    %c0_i32 = arith.constant 0 : i32
    %c0_i32_0 = arith.constant 0 : i32
    %c0_i32_1 = arith.constant 0 : i32
    return %c0_i32, %c0_i32_0 : i32, i32
  }
  func.func @transform_5(%arg0: i32) -> (i32, i32) {
    %c0_i32 = arith.constant 0 : i32
    %c0_i32_0 = arith.constant 0 : i32
    return %arg0, %c0_i32 : i32, i32
  }
}

</mosaic_0001>

<bundles_post_ra>
// kernel: tpu_custom_call.1
= control target key start
LH: loop header
LB: loop body
LE: loop exit
PB: predicated region body
PF: predicated region fallthrough
CT: control target
= control target key end

     0   :  { %10 = vsyncpa [#allocation4], 0  ;;  %s558_s0 = inlined_call_operand.hbm [shape: f32[8,128], index: 0, kind: input, shape index: {}]   ;;  %s559_s1 = inlined_call_operand.hbm [shape: f32[128,128], index: 1, kind: input, shape index: {}]   ;;  %s560_s2 = inlined_call_operand.vmem [shape: f32[1,128], index: 2, kind: input, shape index: {}]   ;;  %s561_s3 = inlined_call_operand.hbm [shape: f32[128,128], index: 3, kind: input, shape index: {}]   ;;  %s562_s4 = inlined_call_operand.vmem [shape: f32[1,128], index: 4, kind: input, shape index: {}]   ;;  %s563_s5 = inlined_call_operand.hbm [shape: f32[8,128], index: 5, kind: output, shape index: {}]  }
   0x1   :  { %11 = vsyncpa [#allocation7], 0 }
   0x2   :  { %12 = vsyncpa [#allocation5], 0  ;;  %s468_s18 = smov [#allocation6]  }
   0x3   :  { %s28_s19 = sshll.u32 %s468_s18, 4  ;;  %s29_s19 = int_to_ptr.vmem [resolvable:$true] %s28_s19 }
   0x4   :  { %s390_s20 = scalar_lea.vmem %s29_s19, 2048  ;;  %p395_p1 = scmp.lt.s32.totalorder %s29_s19, %s29_s19 }
   0x5   :  { %p391_p0 = scmp.ne.s32.totalorder %s29_s19, %s390_s20  ;;  %p396_p2 = scmp.lt.s32.totalorder %s390_s20, %s390_s20 }
   0x7   :  { %p397_p3 = por %p396_p2, %p395_p1 }
   0x9   :  { %p398_p4 = pnand %p397_p3, %p391_p0 }
   0xb   :  { %401 = shalt.err (!%p398_p4)
}
   0xc   :  { %s469_s21 = smov 128   ;;  %s470_s22 = smov 8  }
   0xd   :  { %34 = dma.hbm_to_vmem [thread:$0]  %s559_s1, 2048, %s29_s19, [#allocation7], %s469_s21, %s469_s21, %s470_s22  }
   0xe   :  { %s471_s25 = smov [#allocation3]   ;;  %s472_s27 = smov [#allocation8]  }
   0xf   :  { %s19_s26 = sshll.u32 %s471_s25, 4  ;;  %s42_s28 = sshll.u32 %s472_s27, 4  ;;  %s20_s26 = int_to_ptr.vmem [resolvable:$true] %s19_s26  ;;  %s43_s28 = int_to_ptr.vmem [resolvable:$true] %s42_s28 }
  0x10   :  { %s410_s29 = scalar_lea.vmem %s20_s26, 128  ;;  %p415_p6 = scmp.lt.s32.totalorder %s20_s26, %s20_s26 }
  0x11   :  { %p411_p5 = scmp.ne.s32.totalorder %s20_s26, %s410_s29  ;;  %p416_p7 = scmp.lt.s32.totalorder %s410_s29, %s410_s29 }
  0x13   :  { %p417_p8 = por %p416_p7, %p415_p6 }
  0x15   :  { %p418_p9 = pnand %p417_p8, %p411_p5 }
  0x17   :  { %421 = shalt.err (!%p418_p9)
}
  0x18   :  { %22 = dma.hbm_to_vmem [thread:$0]  %s558_s0, 128, %s20_s26, [#allocation4]  }
  0x19   :  { %s430_s7 = scalar_lea.vmem %s43_s28, 2048  ;;  %p435_p11 = scmp.lt.s32.totalorder %s43_s28, %s43_s28 }
  0x1a   :  { %p431_p10 = scmp.ne.s32.totalorder %s43_s28, %s430_s7  ;;  %p436_p12 = scmp.lt.s32.totalorder %s430_s7, %s430_s7 }
  0x1c   :  { %p437_p13 = por %p436_p12, %p435_p11 }
  0x1e   :  { %p438_p0 = pnand %p437_p13, %p431_p10 }
  0x20   :  { %441 = shalt.err (!%p438_p0)
}
  0x21   :  { %48 = dma.hbm_to_vmem [thread:$0]  %s561_s3, 2048, %s43_s28, [#allocation7], %s469_s21, %s469_s21, %s470_s22  }
  0x22   :  { %462 = dma.done.wait [#allocation4], 128  }
  0x23   :  { %463 = vsyncadd [#allocation4], 4294967168 }
  0x24   :  { %464 = dma.done.wait [#allocation7], 4096  }
  0x25   :  { %465 = vsyncadd [#allocation7], 4294963200  ;;  %v473_v0 = vmov 0.0   ;;  %vm474_vm0 = vmmov 0   ;;  %v76_v1 = vld [vmem:[#allocation6 + $0x78] sm:$0xff]  ;;  %v75_v2 = vld [vmem:[#allocation6 + $0x70] sm:$0xff] }
  0x26   :  { %304 = vmatprep.subr.mxu0 %v473_v0  ;;  %336 = vmatprep.mubr.msk.f32.mxu0 %vm474_vm0, %v473_v0  ;;  %v74_v3 = vld [vmem:[#allocation6 + $0x68] sm:$0xff]  ;;  %v73_v4 = vld [vmem:[#allocation6 + $0x60] sm:$0xff]  ;;  %v172_v5 = vld [vmem:[#allocation8 + $0x78] sm:$0xff]  ;;  %s475_s11 = smov [#allocation9]  }
  0x27   :  { %339 = vmatprep.subr.mxu1 %v473_v0  ;;  %371 = vmatprep.mubr.msk.f32.mxu1 %vm474_vm0, %v473_v0  ;;  %v72_v6 = vld [vmem:[#allocation6 + $0x58] sm:$0xff]  ;;  %v171_v7 = vld [vmem:[#allocation8 + $0x70] sm:$0xff]  ;;  %v170_v8 = vld [vmem:[#allocation8 + $0x68] sm:$0xff]  ;;  %s258_s12 = sshll.u32 %s475_s11, 4  ;;  %s259_s12 = int_to_ptr.vmem [resolvable:$true] %s258_s12 }
  0x28   :  { %305 = vmatpush3.msra.mxu0 %v76_v1  ;;  %340 = vmatpush3.msra.mxu1 %v172_v5  ;;  %v71_v9 = vld [vmem:[#allocation6 + $0x50] sm:$0xff]  ;;  %v169_v10 = vld [vmem:[#allocation8 + $0x60] sm:$0xff]  ;;  %v70_v11 = vld [vmem:[#allocation6 + $0x48] sm:$0xff]  ;;  %s442_s13 = scalar_lea.vmem %s259_s12, 128  ;;  %p447_p2 = scmp.lt.s32.totalorder %s259_s12, %s259_s12 }
  0x29   :  { %306 = vmatprep.subr.mxu0 %v473_v0  ;;  %341 = vmatprep.subr.mxu1 %v473_v0  ;;  %v168_v12 = vld [vmem:[#allocation8 + $0x58] sm:$0xff]  ;;  %v69_v13 = vld [vmem:[#allocation6 + $0x40] sm:$0xff]  ;;  %v167_v14 = vld [vmem:[#allocation8 + $0x50] sm:$0xff]  ;;  %p443_p1 = scmp.ne.s32.totalorder %s259_s12, %s442_s13  ;;  %p448_p3 = scmp.lt.s32.totalorder %s442_s13, %s442_s13 }
  0x2a   :  { %307 = vmatpush3.msra.mxu0 %v75_v2  ;;  %342 = vmatpush3.msra.mxu1 %v171_v7  ;;  %v68_v15 = vld [vmem:[#allocation6 + $0x38] sm:$0xff]  ;;  %v166_v16 = vld [vmem:[#allocation8 + $0x48] sm:$0xff]  ;;  %v67_v17 = vld [vmem:[#allocation6 + $0x30] sm:$0xff] }
  0x2b   :  { %308 = vmatprep.subr.mxu0 %v473_v0  ;;  %343 = vmatprep.subr.mxu1 %v473_v0  ;;  %v165_v18 = vld [vmem:[#allocation8 + $0x40] sm:$0xff]  ;;  %v66_v19 = vld [vmem:[#allocation6 + $0x28] sm:$0xff]  ;;  %v164_v20 = vld [vmem:[#allocation8 + $0x38] sm:$0xff]  ;;  %p449_p4 = por %p448_p3, %p447_p2 }
  0x2c   :  { %309 = vmatpush3.msra.mxu0 %v74_v3  ;;  %344 = vmatpush3.msra.mxu1 %v170_v8  ;;  %v65_v21 = vld [vmem:[#allocation6 + $0x20] sm:$0xff]  ;;  %v163_v22 = vld [vmem:[#allocation8 + $0x30] sm:$0xff]  ;;  %v64_v23 = vld [vmem:[#allocation6 + $0x18] sm:$0xff] }
  0x2d   :  { %310 = vmatprep.subr.mxu0 %v473_v0  ;;  %345 = vmatprep.subr.mxu1 %v473_v0  ;;  %v162_v24 = vld [vmem:[#allocation8 + $0x28] sm:$0xff]  ;;  %v63_v25 = vld [vmem:[#allocation6 + $0x10] sm:$0xff]  ;;  %v161_v26 = vld [vmem:[#allocation8 + $0x20] sm:$0xff]  ;;  %p450_p5 = pnand %p449_p4, %p443_p1 }
  0x2e   :  { %311 = vmatpush3.msra.mxu0 %v73_v4  ;;  %346 = vmatpush3.msra.mxu1 %v169_v10  ;;  %v62_v27 = vld [vmem:[#allocation6 + $0x8] sm:$0xff]  ;;  %v160_v28 = vld [vmem:[#allocation8 + $0x18] sm:$0xff]  ;;  %v61_v29 = vld [vmem:[#allocation6] sm:$0xff] }
  0x2f   :  { %312 = vmatprep.subr.mxu0 %v473_v0  ;;  %347 = vmatprep.subr.mxu1 %v473_v0  ;;  %v60_v30 = vld [vmem:[#allocation3] sm:$0xff]  ;;  %v159_v31 = vld [vmem:[#allocation8 + $0x10] sm:$0xff]  ;;  %v158_v32 = vld [vmem:[#allocation8 + $0x8] sm:$0xff] }
  0x30   :  { %313 = vmatpush3.msra.mxu0 %v72_v6  ;;  %348 = vmatpush3.msra.mxu1 %v168_v12  ;;  %v157_v33 = vld [vmem:[#allocation8] sm:$0xff]  ;;  %v268_v34 = vld [vmem:[%s560_s2] ss:$0 sm:$0xff] }
  0x31   :  { %314 = vmatprep.subr.mxu0 %v473_v0  ;;  %349 = vmatprep.subr.mxu1 %v473_v0  ;;  %v269_v39 = vld [vmem:[%s562_s4] ss:$0 sm:$0xff] }
  0x32   :  { %315 = vmatpush3.msra.mxu0 %v71_v9  ;;  %350 = vmatpush3.msra.mxu1 %v167_v14 }
  0x33   :  { %316 = vmatprep.subr.mxu0 %v473_v0  ;;  %351 = vmatprep.subr.mxu1 %v473_v0 }
  0x34   :  { %317 = vmatpush3.msra.mxu0 %v70_v11  ;;  %352 = vmatpush3.msra.mxu1 %v166_v16 }
  0x35   :  { %318 = vmatprep.subr.mxu0 %v473_v0  ;;  %353 = vmatprep.subr.mxu1 %v473_v0 }
  0x36   :  { %319 = vmatpush3.msra.mxu0 %v69_v13  ;;  %354 = vmatpush3.msra.mxu1 %v165_v18 }
  0x37   :  { %320 = vmatprep.subr.mxu0 %v473_v0  ;;  %355 = vmatprep.subr.mxu1 %v473_v0 }
  0x38   :  { %321 = vmatpush3.msra.mxu0 %v68_v15  ;;  %356 = vmatpush3.msra.mxu1 %v164_v20 }
  0x39   :  { %322 = vmatprep.subr.mxu0 %v473_v0  ;;  %357 = vmatprep.subr.mxu1 %v473_v0 }
  0x3a   :  { %323 = vmatpush3.msra.mxu0 %v67_v17  ;;  %358 = vmatpush3.msra.mxu1 %v163_v22 }
  0x3b   :  { %324 = vmatprep.subr.mxu0 %v473_v0  ;;  %359 = vmatprep.subr.mxu1 %v473_v0 }
  0x3c   :  { %325 = vmatpush3.msra.mxu0 %v66_v19  ;;  %360 = vmatpush3.msra.mxu1 %v162_v24 }
  0x3d   :  { %326 = vmatprep.subr.mxu0 %v473_v0  ;;  %361 = vmatprep.subr.mxu1 %v473_v0 }
  0x3e   :  { %327 = vmatpush3.msra.mxu0 %v65_v21  ;;  %362 = vmatpush3.msra.mxu1 %v161_v26 }
  0x3f   :  { %328 = vmatprep.subr.mxu0 %v473_v0  ;;  %363 = vmatprep.subr.mxu1 %v473_v0 }
  0x40   :  { %329 = vmatpush3.msra.mxu0 %v64_v23  ;;  %364 = vmatpush3.msra.mxu1 %v160_v28 }
  0x41   :  { %330 = vmatprep.subr.mxu0 %v473_v0  ;;  %365 = vmatprep.subr.mxu1 %v473_v0 }
  0x42   :  { %331 = vmatpush3.msra.mxu0 %v63_v25  ;;  %366 = vmatpush3.msra.mxu1 %v159_v31 }
  0x43   :  { %332 = vmatprep.subr.mxu0 %v473_v0  ;;  %367 = vmatprep.subr.mxu1 %v473_v0 }
  0x44   :  { %333 = vmatpush3.msra.mxu0 %v62_v27  ;;  %368 = vmatpush3.msra.mxu1 %v158_v32 }
  0x45   :  { %334 = vmatprep.subr.mxu0 %v473_v0  ;;  %369 = vmatprep.subr.mxu1 %v473_v0 }
  0x46   :  { %335 = vmatpush3.msra.mxu0 %v61_v29  ;;  %370 = vmatpush3.msra.mxu1 %v157_v33 }
  0x47   :  { %337 = vmatmul.mubr.f32.vlgmr.msra.gmra.mxu0 %v60_v30 }
 0x107   :  { %v150_v35 = vpop.f32.mrf.mxu0 }
 0x108   :  { %v151_v36 = vadd.f32 %v268_v34, %v150_v35 }
 0x109   :  { %v338_v37 = vpop.f32.mrf.mxu0 }
 0x10a   :  { %v154_v38 = vmax.f32 %v151_v36, 0.0 }
 0x10c   :  { %372 = vmatmul.mubr.f32.vlgmr.msra.gmra.mxu1 %v154_v38 }
 0x1cc   :  { %v246_v40 = vpop.f32.mrf.mxu1 }
 0x1cd   :  { %v247_v41 = vadd.f32 %v269_v39, %v246_v40 }
 0x1ce   :  { %v373_v42 = vpop.f32.mrf.mxu1 }
 0x1cf   :  { %v250_v43 = vmax.f32 %v247_v41, 0.0 }
 0x1d1   :  { %251 = vst [vmem:[#allocation9] sm:$0xff] %v250_v43 }
 0x1d2   :  { %453 = shalt.err (!%p450_p5)
}
 0x1d3   :  { %261 = dma.vmem_to_hbm [thread:$0]  %s259_s12, 128, %s563_s5, [#allocation5]  }
 0x1d4   :  { %466 = dma.done.wait [#allocation5], 128  }
 0x1d5   :  { %467 = vsyncadd [#allocation5], 4294967168 }
 0x1d6   :  { %265 = vsyncpa [#allocation4], 1 }
 0x1d7   :  { %266 = vsyncpa [#allocation7], 1 }
 0x1d8   :  { %267 = vsyncpa [#allocation5], 1 }

</bundles_post_ra>
